<compile_context>
chip_gen: v7x
topology: tpu7x:2x2x1
jax: 0.10.0
libtpu: 0.0.40
codegen_flags: <defaults>
</compile_context>

<pallas_src>
import functools

import jax
import jax.numpy as jnp
import numpy as np
from jax.experimental import pallas as pl
from jax.experimental.pallas import tpu as pltpu

# ----------------- hyper-params (stand-in for the argparse `args`) -----------------
BERT_DIM = 768      # BERT CLS width (input_dim of the MLPs)
HIDDEN   = 32       # args.hidden
EMBED    = 16       # args.embed_size  (power of two -> pairwise-tree row product)
BATCH    = 8

MARGIN   = 0.1      # args.margin
EPSILON  = 0.02     # args.epsilon
SIZE     = 0.05     # args.size
ALPHA    = 1.0      # args.alpha
GAMMA    = 0.1      # args.gamma
EXTRA    = 0.5      # args.extra

assert EMBED & (EMBED - 1) == 0, "row-product tree assumes embed_size is a power of 2"
assert HIDDEN >= EMBED

# TODO(synk): args.dropout / nn.Dropout is omitted (inference semantics, p = 0).
# TODO(synk): the BERT encoder of projection_box is not reproduced; the kernel takes
#             pre-computed CLS embeddings ( = pre_train_model(...)[0][:, 0, :] ).


# =============================== in-kernel helpers ==================================
def _sum2d(x):
    # sum over a (R, C) tile -> (1, 1); lane reduce then sublane reduce.
    return jnp.sum(jnp.sum(x, axis=1, keepdims=True), axis=0, keepdims=True)


def _prod_rows(x):
    # Exact row-wise product of a (R, E) tile (E = power of two) via a pairwise
    # halving tree of static lane slices: matches torch.prod (up to multiply order)
    # and avoids the log/exp round-trip through the single EUP slot.
    n = x.shape[1]
    while n > 1:
        h = n // 2
        x = x[:, :h] * x[:, h:n]
        n = h
    return x                                                        # (R, 1)


# ================================= fused kernel =====================================
def _fused_kernel(p_ref, c_ref, n_ref, w1_ref, w2_ref, b_ref, out_ref, *,
                  batch, hidden, embed, margin, epsilon, size, alpha, gamma, extra):
    B, H, E = batch, hidden, embed
    bf16 = jnp.bfloat16
    f32 = jnp.float32

    w1 = w1_ref[...]                            # (768, 2H) bf16 (pre-fused, pre-cast)
    w2 = w2_ref[...]                            # (2H, 2E)  bf16 block-diagonal
    b1 = b_ref[0:1, 0:2 * H]                    # (1, 2H) f32
    b2 = b_ref[1:2, 0:2 * E]                    # (1, 2E) f32

    def proj(x):                                # x: (B, 768) bf16
        h = jnp.dot(x, w1, preferred_element_type=f32) + b1         # (B, 2H)
        h = jnp.maximum(h, 0.0)                                      # ReLU (f32 VPU)
        o = jnp.dot(h.astype(bf16), w2, preferred_element_type=f32) + b2  # (B, 2E)
        return o[:, :E], o[:, E:2 * E]          # center, pre-exp delta

    pc, praw = proj(p_ref[...])
    cc, craw = proj(c_ref[...])
    nc, nraw = proj(n_ref[...])

    pd = jnp.maximum(jnp.exp(praw), 1e-38)      # .clamp_min(1e-38)
    cd = jnp.maximum(jnp.exp(craw), 1e-38)
    nd = jnp.maximum(jnp.exp(nraw), 1e-38)

    parent_left, parent_right = pc - pd, pc + pd
    child_left,  child_right  = cc - cd, cc + cd
    neg_left,    neg_right    = nc - nd, nc + nd

    nelem = float(B * E)
    Bf = float(B)

    # ------------------------- parent_child_contain_loss ---------------------------
    diff_left = child_left - parent_left
    e_l = jnp.where(diff_left < margin, diff_left - margin, 0.0)
    diff_right = parent_right - child_right
    e_r = jnp.where(diff_right < margin, diff_right - margin, 0.0)
    pc_contain = (_sum2d(e_l * e_l) + _sum2d(e_r * e_r)) * (0.5 / nelem)

    # ------ fused (child|parent) and (child|negative) intersections on (2B, E) -----
    other_left  = jnp.concatenate([parent_left,  neg_left],  axis=0)
    other_right = jnp.concatenate([parent_right, neg_right], axis=0)
    child_left2  = jnp.concatenate([child_left,  child_left],  axis=0)
    child_right2 = jnp.concatenate([child_right, child_right], axis=0)
    cd2 = jnp.concatenate([cd, cd], axis=0)

    il = jnp.maximum(child_left2, other_left)
    ir = jnp.minimum(child_right2, other_right)
    idel = (ir - il) * 0.5                                           # (2B, E)

    # condition_score for both pairs: mask, divide by child delta, row product.
    score = _prod_rows(jnp.where(idel > 0.0, idel, 0.0) / cd2)       # (2B, 1)
    pos_score = score[0:B]
    neg_score = score[B:2 * B]
    pos_prob = _sum2d((pos_score - 1.0) ** 2) / Bf
    neg_prob = _sum2d(neg_score * neg_score) / Bf

    # negative_contain_loss uses the (child, negative) intersection only
    idel_n = idel[B:2 * B]
    e_n = jnp.where(idel_n > epsilon, idel_n - epsilon, 0.0)
    neg_contain = _sum2d(e_n * e_n) / nelem

    # --------------- box_regularization (child CENTER, as in forward()) ------------
    def box_reg(d):
        e = jnp.where(d < size, d - size, 0.0)
        return _sum2d(e * e) / nelem

    reg = box_reg(pd) + box_reg(cc) + box_reg(nd)

    loss_contain  = alpha * pc_contain
    loss_negative = alpha * neg_contain
    regular_loss  = gamma * reg
    loss_pos_prob = extra * pos_prob
    loss_neg_prob = extra * neg_prob
    total = (loss_contain + loss_negative + regular_loss
             + loss_pos_prob + loss_neg_prob)

    # Simple epilogue: six tiny static-slice stores into one (1, 8) output tile.
    out_ref[...] = jnp.zeros((1, 8), jnp.float32)
    out_ref[:, 0:1] = total
    out_ref[:, 1:2] = loss_contain
    out_ref[:, 2:3] = loss_negative
    out_ref[:, 3:4] = regular_loss
    out_ref[:, 4:5] = loss_pos_prob
    out_ref[:, 5:6] = loss_neg_prob


# ============================ one-time weight fusion ================================
def fuse_params(params):
    """Build the fused/bf16 weights ONCE (outside the training step)."""
    # Concatenated first layer: one (768, 2H) matmul instead of two (768, H).
    w1 = jnp.concatenate([params["wc1"], params["wd1"]], axis=1).astype(jnp.bfloat16)
    # Block-diagonal second layer: one (2H, 2E) matmul; the zero blocks add exactly 0.
    z = jnp.zeros((HIDDEN, EMBED), jnp.float32)
    w2 = jnp.concatenate(
        [jnp.concatenate([params["wc2"], z], axis=1),
         jnp.concatenate([z, params["wd2"]], axis=1)], axis=0).astype(jnp.bfloat16)
    # Pack all four biases into one small f32 (2, max(2H, 2E)) operand (fewer DMAs).
    w = max(2 * HIDDEN, 2 * EMBED)
    row1 = jnp.concatenate([params["bc1"], params["bd1"]], axis=1)   # (1, 2H)
    row2 = jnp.concatenate([params["bc2"], params["bd2"]], axis=1)   # (1, 2E)
    row1 = jnp.pad(row1, ((0, 0), (0, w - 2 * HIDDEN)))
    row2 = jnp.pad(row2, ((0, 0), (0, w - 2 * EMBED)))
    bias = jnp.concatenate([row1, row2], axis=0)                     # (2, w) f32
    return {"w1": w1, "w2": w2, "bias": bias}


# ================================== full forward ====================================
@jax.jit
def box_embed_forward(fused, cls_parent, cls_child, cls_neg):
    """BoxEmbed.forward(flag='train') on pre-computed CLS embeddings — one fused kernel."""
    B = cls_parent.shape[0]
    # bf16 cast in the wrapper (fuses with the upstream CLS slice; halves activation DMA).
    p = cls_parent.astype(jnp.bfloat16)
    c = cls_child.astype(jnp.bfloat16)
    n = cls_neg.astype(jnp.bfloat16)

    vmem = pl.BlockSpec(memory_space=pltpu.MemorySpace.VMEM)
    kernel = functools.partial(
        _fused_kernel, batch=B, hidden=HIDDEN, embed=EMBED, margin=MARGIN,
        epsilon=EPSILON, size=SIZE, alpha=ALPHA, gamma=GAMMA, extra=EXTRA)

    flops = (2 * 3 * B * BERT_DIM * 2 * HIDDEN
             + 2 * 3 * B * 2 * HIDDEN * 2 * EMBED)
    bytes_accessed = (3 * B * BERT_DIM * 2            # bf16 CLS
                      + fused["w1"].size * 2          # bf16 w1
                      + fused["w2"].size * 2          # bf16 w2
                      + fused["bias"].size * 4        # f32 biases
                      + 8 * 4)                        # output
    cost = pl.CostEstimate(flops=flops, transcendentals=3 * B * EMBED,
                           bytes_accessed=bytes_accessed)

    # Single invocation, no grid, single TensorCore: the whole problem is <1 MiB and
    # latency-bound (batch multiple triples / add a parallel grid axis only if the
    # effective batch grows toward the MXU M dimension).
    packed = pl.pallas_call(
        kernel,
        out_shape=jax.ShapeDtypeStruct((1, 8), jnp.float32),
        in_specs=[vmem] * 6,
        out_specs=vmem,
        cost_estimate=cost,
    )(p, c, n, fused["w1"], fused["w2"], fused["bias"])
    return (packed[0, 0], packed[0, 1], packed[0, 2],
            packed[0, 3], packed[0, 4], packed[0, 5])


# ---------------------------- pure-JAX reference (sanity) ---------------------------
def _reference_forward(params, cls_p, cls_c, cls_n):
    # Mirrors the kernel's MXU convention (bf16 matmul operands, f32 accumulation);
    # everything else is a straight transcription of BoxEmbed.forward.
    def mm(a, b):
        return jnp.dot(a.astype(jnp.bfloat16), b.astype(jnp.bfloat16),
                       preferred_element_type=jnp.float32)

    def proj(x):
        hc = jnp.maximum(mm(x, params["wc1"]) + params["bc1"], 0.0)
        c = mm(hc, params["wc2"]) + params["bc2"]
        hd = jnp.maximum(mm(x, params["wd1"]) + params["bd1"], 0.0)
        d = jnp.maximum(jnp.exp(mm(hd, params["wd2"]) + params["bd2"]), 1e-38)
        return c, d

    pc, pd = proj(cls_p); cc, cd = proj(cls_c); nc, nd = proj(cls_n)

    dl = (cc - cd) - (pc - pd)
    lm = (dl < MARGIN).astype(jnp.float32)
    dr = (pc + pd) - (cc + cd)
    rm = (dr < MARGIN).astype(jnp.float32)
    contain = (jnp.mean((dl * lm - MARGIN * lm) ** 2)
               + jnp.mean((dr * rm - MARGIN * rm) ** 2)) / 2.0

    def score(chc, chd, bc, bd):
        il = jnp.maximum(chc - chd, bc - bd)
        ir = jnp.minimum(chc + chd, bc + bd)
        idel = (ir - il) / 2.0
        m = (idel > 0.0).astype(jnp.float32)
        return jnp.prod((idel * m) / chd, axis=1)

    pos_prob = jnp.mean((score(cc, cd, pc, pd) - 1.0) ** 2)
    il = jnp.maximum(cc - cd, nc - nd)
    ir = jnp.minimum(cc + cd, nc + nd)
    idel = (ir - il) / 2.0
    im = (idel > EPSILON).astype(jnp.float32)
    neg = jnp.mean((idel * im - EPSILON * im) ** 2)
    neg_prob = jnp.mean(score(cc, cd, nc, nd) ** 2)

    def reg(d):
        m = (d < SIZE).astype(jnp.float32)
        return jnp.mean((d * m - SIZE * m) ** 2)

    regular = GAMMA * (reg(pd) + reg(cc) + reg(nd))
    lc, ln = ALPHA * contain, ALPHA * neg
    lp, lnp_ = EXTRA * pos_prob, EXTRA * neg_prob
    return (lc + ln + regular + lp + lnp_, lc, ln, regular, lp, lnp_)


# ====================================== main ========================================
def init_params(key):
    ks = jax.random.split(key, 8)
    s1, s2 = 1.0 / np.sqrt(BERT_DIM), 1.0 / np.sqrt(HIDDEN)
    return {
        "wc1": jax.random.normal(ks[0], (BERT_DIM, HIDDEN), jnp.float32) * s1,
        "bc1": jax.random.normal(ks[1], (1, HIDDEN), jnp.float32) * 0.01,
        "wc2": jax.random.normal(ks[2], (HIDDEN, EMBED), jnp.float32) * s2,
        "bc2": jax.random.normal(ks[3], (1, EMBED), jnp.float32) * 0.01,
        "wd1": jax.random.normal(ks[4], (BERT_DIM, HIDDEN), jnp.float32) * s1,
        "bd1": jax.random.normal(ks[5], (1, HIDDEN), jnp.float32) * 0.01,
        "wd2": jax.random.normal(ks[6], (HIDDEN, EMBED), jnp.float32) * s2,
        "bd2": jax.random.normal(ks[7], (1, EMBED), jnp.float32) * 0.01,
    }


if __name__ == "__main__":
    root = jax.random.PRNGKey(0)
    kp, kin = jax.random.split(root)
    params = init_params(kp)
    fused = fuse_params(params)          # one-time weight fusion, hoisted out of the step

    k1, k2, k3 = jax.random.split(kin, 3)
    cls_parent = jax.random.normal(k1, (BATCH, BERT_DIM), jnp.float32)
    cls_child = jax.random.normal(k2, (BATCH, BERT_DIM), jnp.float32)
    cls_neg = jax.random.normal(k3, (BATCH, BERT_DIM), jnp.float32)

    out = box_embed_forward(fused, cls_parent, cls_child, cls_neg)
    out = jax.block_until_ready(out)

    ref = _reference_forward(params, cls_parent, cls_child, cls_neg)
    np.testing.assert_allclose(np.array(out), np.array(ref), rtol=2e-3, atol=1e-6)

    print("KERNEL_OK")
</pallas_src>

<mosaic_0001>
module attributes {stable_mosaic.version = 11 : i64} {
  func.func @_fused_kernel(%arg0: memref<8x768xbf16, #tpu.memory_space<vmem>>, %arg1: memref<8x768xbf16, #tpu.memory_space<vmem>>, %arg2: memref<8x768xbf16, #tpu.memory_space<vmem>>, %arg3: memref<768x64xbf16, #tpu.memory_space<vmem>>, %arg4: memref<64x32xbf16, #tpu.memory_space<vmem>>, %arg5: memref<2x64xf32, #tpu.memory_space<vmem>>, %arg6: memref<1x8xf32, #tpu.memory_space<vmem>>) attributes {dimension_semantics = [], scalar_prefetch = 0 : i64, scratch_operands = 0 : i64, tpu.core_type = #tpu.core_type<tc>} {
    %c0 = arith.constant 0 : index
    %c0_0 = arith.constant 0 : index
    %0 = vector.load %arg3[%c0, %c0_0] : memref<768x64xbf16, #tpu.memory_space<vmem>>, vector<768x64xbf16>
    %c0_1 = arith.constant 0 : index
    %c0_2 = arith.constant 0 : index
    %1 = vector.load %arg4[%c0_1, %c0_2] : memref<64x32xbf16, #tpu.memory_space<vmem>>, vector<64x32xbf16>
    %c0_3 = arith.constant 0 : index
    %c0_4 = arith.constant 0 : index
    %2 = vector.load %arg5[%c0_3, %c0_4] : memref<2x64xf32, #tpu.memory_space<vmem>>, vector<1x64xf32>
    %c1 = arith.constant 1 : index
    %c0_5 = arith.constant 0 : index
    %3 = vector.load %arg5[%c1, %c0_5] : memref<2x64xf32, #tpu.memory_space<vmem>>, vector<1x32xf32>
    %c0_6 = arith.constant 0 : index
    %c0_7 = arith.constant 0 : index
    %4 = vector.load %arg0[%c0_6, %c0_7] : memref<8x768xbf16, #tpu.memory_space<vmem>>, vector<8x768xbf16>
    %cst = arith.constant dense<0.000000e+00> : vector<8x64xf32>
    %5 = tpu.matmul %4, %0, %cst {dimension_numbers = #tpu.dot_dimension_numbers<[1], [0], [0], [1], [0, 0, 1, 1], [], []>} : vector<8x768xbf16>, vector<768x64xbf16>, vector<8x64xf32> -> vector<8x64xf32>
    %6 = vector.broadcast %2 : vector<1x64xf32> to vector<8x64xf32>
    %7 = arith.addf %5, %6 : vector<8x64xf32>
    %cst_8 = arith.constant 0.000000e+00 : f32
    %8 = vector.broadcast %cst_8 : f32 to vector<8x64xf32>
    %9 = arith.maximumf %7, %8 : vector<8x64xf32>
    %10 = arith.truncf %9 : vector<8x64xf32> to vector<8x64xbf16>
    %cst_9 = arith.constant dense<0.000000e+00> : vector<8x32xf32>
    %11 = tpu.matmul %10, %1, %cst_9 {dimension_numbers = #tpu.dot_dimension_numbers<[1], [0], [0], [1], [0, 0, 1, 1], [], []>} : vector<8x64xbf16>, vector<64x32xbf16>, vector<8x32xf32> -> vector<8x32xf32>
    %12 = vector.broadcast %3 : vector<1x32xf32> to vector<8x32xf32>
    %13 = arith.addf %11, %12 : vector<8x32xf32>
    %14 = vector.extract_strided_slice %13 {offsets = [0, 0], sizes = [8, 16], strides = [1, 1]} : vector<8x32xf32> to vector<8x16xf32>
    %15 = vector.extract_strided_slice %13 {offsets = [0, 16], sizes = [8, 16], strides = [1, 1]} : vector<8x32xf32> to vector<8x16xf32>
    %c0_10 = arith.constant 0 : index
    %c0_11 = arith.constant 0 : index
    %16 = vector.load %arg1[%c0_10, %c0_11] : memref<8x768xbf16, #tpu.memory_space<vmem>>, vector<8x768xbf16>
    %cst_12 = arith.constant dense<0.000000e+00> : vector<8x64xf32>
    %17 = tpu.matmul %16, %0, %cst_12 {dimension_numbers = #tpu.dot_dimension_numbers<[1], [0], [0], [1], [0, 0, 1, 1], [], []>} : vector<8x768xbf16>, vector<768x64xbf16>, vector<8x64xf32> -> vector<8x64xf32>
    %18 = vector.broadcast %2 : vector<1x64xf32> to vector<8x64xf32>
    %19 = arith.addf %17, %18 : vector<8x64xf32>
    %cst_13 = arith.constant 0.000000e+00 : f32
    %20 = vector.broadcast %cst_13 : f32 to vector<8x64xf32>
    %21 = arith.maximumf %19, %20 : vector<8x64xf32>
    %22 = arith.truncf %21 : vector<8x64xf32> to vector<8x64xbf16>
    %cst_14 = arith.constant dense<0.000000e+00> : vector<8x32xf32>
    %23 = tpu.matmul %22, %1, %cst_14 {dimension_numbers = #tpu.dot_dimension_numbers<[1], [0], [0], [1], [0, 0, 1, 1], [], []>} : vector<8x64xbf16>, vector<64x32xbf16>, vector<8x32xf32> -> vector<8x32xf32>
    %24 = vector.broadcast %3 : vector<1x32xf32> to vector<8x32xf32>
    %25 = arith.addf %23, %24 : vector<8x32xf32>
    %26 = vector.extract_strided_slice %25 {offsets = [0, 0], sizes = [8, 16], strides = [1, 1]} : vector<8x32xf32> to vector<8x16xf32>
    %27 = vector.extract_strided_slice %25 {offsets = [0, 16], sizes = [8, 16], strides = [1, 1]} : vector<8x32xf32> to vector<8x16xf32>
    %c0_15 = arith.constant 0 : index
    %c0_16 = arith.constant 0 : index
    %28 = vector.load %arg2[%c0_15, %c0_16] : memref<8x768xbf16, #tpu.memory_space<vmem>>, vector<8x768xbf16>
    %cst_17 = arith.constant dense<0.000000e+00> : vector<8x64xf32>
    %29 = tpu.matmul %28, %0, %cst_17 {dimension_numbers = #tpu.dot_dimension_numbers<[1], [0], [0], [1], [0, 0, 1, 1], [], []>} : vector<8x768xbf16>, vector<768x64xbf16>, vector<8x64xf32> -> vector<8x64xf32>
    %30 = vector.broadcast %2 : vector<1x64xf32> to vector<8x64xf32>
    %31 = arith.addf %29, %30 : vector<8x64xf32>
    %cst_18 = arith.constant 0.000000e+00 : f32
    %32 = vector.broadcast %cst_18 : f32 to vector<8x64xf32>
    %33 = arith.maximumf %31, %32 : vector<8x64xf32>
    %34 = arith.truncf %33 : vector<8x64xf32> to vector<8x64xbf16>
    %cst_19 = arith.constant dense<0.000000e+00> : vector<8x32xf32>
    %35 = tpu.matmul %34, %1, %cst_19 {dimension_numbers = #tpu.dot_dimension_numbers<[1], [0], [0], [1], [0, 0, 1, 1], [], []>} : vector<8x64xbf16>, vector<64x32xbf16>, vector<8x32xf32> -> vector<8x32xf32>
    %36 = vector.broadcast %3 : vector<1x32xf32> to vector<8x32xf32>
    %37 = arith.addf %35, %36 : vector<8x32xf32>
    %38 = vector.extract_strided_slice %37 {offsets = [0, 0], sizes = [8, 16], strides = [1, 1]} : vector<8x32xf32> to vector<8x16xf32>
    %39 = vector.extract_strided_slice %37 {offsets = [0, 16], sizes = [8, 16], strides = [1, 1]} : vector<8x32xf32> to vector<8x16xf32>
    %40 = math.exp %15 : vector<8x16xf32>
    %cst_20 = arith.constant 9.99999935E-39 : f32
    %41 = vector.broadcast %cst_20 : f32 to vector<8x16xf32>
    %42 = arith.maximumf %40, %41 : vector<8x16xf32>
    %43 = math.exp %27 : vector<8x16xf32>
    %cst_21 = arith.constant 9.99999935E-39 : f32
    %44 = vector.broadcast %cst_21 : f32 to vector<8x16xf32>
    %45 = arith.maximumf %43, %44 : vector<8x16xf32>
    %46 = math.exp %39 : vector<8x16xf32>
    %cst_22 = arith.constant 9.99999935E-39 : f32
    %47 = vector.broadcast %cst_22 : f32 to vector<8x16xf32>
    %48 = arith.maximumf %46, %47 : vector<8x16xf32>
    %49 = arith.subf %14, %42 : vector<8x16xf32>
    %50 = arith.addf %14, %42 : vector<8x16xf32>
    %51 = arith.subf %26, %45 : vector<8x16xf32>
    %52 = arith.addf %26, %45 : vector<8x16xf32>
    %53 = arith.subf %38, %48 : vector<8x16xf32>
    %54 = arith.addf %38, %48 : vector<8x16xf32>
    %55 = arith.subf %51, %49 : vector<8x16xf32>
    %cst_23 = arith.constant 1.000000e-01 : f32
    %56 = vector.broadcast %cst_23 : f32 to vector<8x16xf32>
    %57 = arith.cmpf olt, %55, %56 : vector<8x16xf32>
    %cst_24 = arith.constant 1.000000e-01 : f32
    %58 = vector.broadcast %cst_24 : f32 to vector<8x16xf32>
    %59 = arith.subf %55, %58 : vector<8x16xf32>
    %cst_25 = arith.constant 0.000000e+00 : f32
    %60 = vector.broadcast %cst_25 : f32 to vector<8x16xf32>
    %61 = arith.select %57, %59, %60 : vector<8x16xi1>, vector<8x16xf32>
    %62 = arith.subf %50, %52 : vector<8x16xf32>
    %cst_26 = arith.constant 1.000000e-01 : f32
    %63 = vector.broadcast %cst_26 : f32 to vector<8x16xf32>
    %64 = arith.cmpf olt, %62, %63 : vector<8x16xf32>
    %cst_27 = arith.constant 1.000000e-01 : f32
    %65 = vector.broadcast %cst_27 : f32 to vector<8x16xf32>
    %66 = arith.subf %62, %65 : vector<8x16xf32>
    %cst_28 = arith.constant 0.000000e+00 : f32
    %67 = vector.broadcast %cst_28 : f32 to vector<8x16xf32>
    %68 = arith.select %64, %66, %67 : vector<8x16xi1>, vector<8x16xf32>
    %69 = arith.mulf %61, %61 : vector<8x16xf32>
    %cst_29 = arith.constant dense<0.000000e+00> : vector<8xf32>
    %70 = vector.multi_reduction <add>, %69, %cst_29 [1] : vector<8x16xf32> to vector<8xf32>
    %71 = vector.shape_cast %70 : vector<8xf32> to vector<8x1xf32>
    %cst_30 = arith.constant dense<0.000000e+00> : vector<1xf32>
    %72 = vector.multi_reduction <add>, %71, %cst_30 [0] : vector<8x1xf32> to vector<1xf32>
    %73 = vector.shape_cast %72 : vector<1xf32> to vector<1x1xf32>
    %74 = arith.mulf %68, %68 : vector<8x16xf32>
    %cst_31 = arith.constant dense<0.000000e+00> : vector<8xf32>
    %75 = vector.multi_reduction <add>, %74, %cst_31 [1] : vector<8x16xf32> to vector<8xf32>
    %76 = vector.shape_cast %75 : vector<8xf32> to vector<8x1xf32>
    %cst_32 = arith.constant dense<0.000000e+00> : vector<1xf32>
    %77 = vector.multi_reduction <add>, %76, %cst_32 [0] : vector<8x1xf32> to vector<1xf32>
    %78 = vector.shape_cast %77 : vector<1xf32> to vector<1x1xf32>
    %79 = arith.addf %73, %78 : vector<1x1xf32>
    %cst_33 = arith.constant 3.906250e-03 : f32
    %80 = vector.broadcast %cst_33 : f32 to vector<1x1xf32>
    %81 = arith.mulf %79, %80 : vector<1x1xf32>
    %82 = tpu.concatenate %49, %53 in 0 : vector<8x16xf32>, vector<8x16xf32> -> vector<16x16xf32>
    %83 = tpu.concatenate %50, %54 in 0 : vector<8x16xf32>, vector<8x16xf32> -> vector<16x16xf32>
    %84 = tpu.concatenate %51, %51 in 0 : vector<8x16xf32>, vector<8x16xf32> -> vector<16x16xf32>
    %85 = tpu.concatenate %52, %52 in 0 : vector<8x16xf32>, vector<8x16xf32> -> vector<16x16xf32>
    %86 = tpu.concatenate %45, %45 in 0 : vector<8x16xf32>, vector<8x16xf32> -> vector<16x16xf32>
    %87 = arith.maximumf %84, %82 : vector<16x16xf32>
    %88 = arith.minimumf %85, %83 : vector<16x16xf32>
    %89 = arith.subf %88, %87 : vector<16x16xf32>
    %cst_34 = arith.constant 5.000000e-01 : f32
    %90 = vector.broadcast %cst_34 : f32 to vector<16x16xf32>
    %91 = arith.mulf %89, %90 : vector<16x16xf32>
    %cst_35 = arith.constant 0.000000e+00 : f32
    %92 = vector.broadcast %cst_35 : f32 to vector<16x16xf32>
    %93 = arith.cmpf ogt, %91, %92 : vector<16x16xf32>
    %cst_36 = arith.constant 0.000000e+00 : f32
    %94 = vector.broadcast %cst_36 : f32 to vector<16x16xf32>
    %95 = arith.select %93, %91, %94 : vector<16x16xi1>, vector<16x16xf32>
    %96 = arith.divf %95, %86 : vector<16x16xf32>
    %97 = vector.extract_strided_slice %96 {offsets = [0, 0], sizes = [16, 8], strides = [1, 1]} : vector<16x16xf32> to vector<16x8xf32>
    %98 = vector.extract_strided_slice %96 {offsets = [0, 8], sizes = [16, 8], strides = [1, 1]} : vector<16x16xf32> to vector<16x8xf32>
    %99 = arith.mulf %97, %98 : vector<16x8xf32>
    %100 = vector.extract_strided_slice %99 {offsets = [0, 0], sizes = [16, 4], strides = [1, 1]} : vector<16x8xf32> to vector<16x4xf32>
    %101 = vector.extract_strided_slice %99 {offsets = [0, 4], sizes = [16, 4], strides = [1, 1]} : vector<16x8xf32> to vector<16x4xf32>
    %102 = arith.mulf %100, %101 : vector<16x4xf32>
    %103 = vector.extract_strided_slice %102 {offsets = [0, 0], sizes = [16, 2], strides = [1, 1]} : vector<16x4xf32> to vector<16x2xf32>
    %104 = vector.extract_strided_slice %102 {offsets = [0, 2], sizes = [16, 2], strides = [1, 1]} : vector<16x4xf32> to vector<16x2xf32>
    %105 = arith.mulf %103, %104 : vector<16x2xf32>
    %106 = vector.extract_strided_slice %105 {offsets = [0, 0], sizes = [16, 1], strides = [1, 1]} : vector<16x2xf32> to vector<16x1xf32>
    %107 = vector.extract_strided_slice %105 {offsets = [0, 1], sizes = [16, 1], strides = [1, 1]} : vector<16x2xf32> to vector<16x1xf32>
    %108 = arith.mulf %106, %107 : vector<16x1xf32>
    %109 = vector.extract_strided_slice %108 {offsets = [0, 0], sizes = [8, 1], strides = [1, 1]} : vector<16x1xf32> to vector<8x1xf32>
    %110 = vector.extract_strided_slice %108 {offsets = [8, 0], sizes = [8, 1], strides = [1, 1]} : vector<16x1xf32> to vector<8x1xf32>
    %cst_37 = arith.constant 1.000000e+00 : f32
    %111 = vector.broadcast %cst_37 : f32 to vector<8x1xf32>
    %112 = arith.subf %109, %111 : vector<8x1xf32>
    %113 = arith.mulf %112, %112 : vector<8x1xf32>
    %cst_38 = arith.constant dense<0.000000e+00> : vector<8xf32>
    %114 = vector.multi_reduction <add>, %113, %cst_38 [1] : vector<8x1xf32> to vector<8xf32>
    %115 = vector.shape_cast %114 : vector<8xf32> to vector<8x1xf32>
    %cst_39 = arith.constant dense<0.000000e+00> : vector<1xf32>
    %116 = vector.multi_reduction <add>, %115, %cst_39 [0] : vector<8x1xf32> to vector<1xf32>
    %117 = vector.shape_cast %116 : vector<1xf32> to vector<1x1xf32>
    %cst_40 = arith.constant 8.000000e+00 : f32
    %118 = vector.broadcast %cst_40 : f32 to vector<1x1xf32>
    %119 = arith.divf %117, %118 : vector<1x1xf32>
    %120 = arith.mulf %110, %110 : vector<8x1xf32>
    %cst_41 = arith.constant dense<0.000000e+00> : vector<8xf32>
    %121 = vector.multi_reduction <add>, %120, %cst_41 [1] : vector<8x1xf32> to vector<8xf32>
    %122 = vector.shape_cast %121 : vector<8xf32> to vector<8x1xf32>
    %cst_42 = arith.constant dense<0.000000e+00> : vector<1xf32>
    %123 = vector.multi_reduction <add>, %122, %cst_42 [0] : vector<8x1xf32> to vector<1xf32>
    %124 = vector.shape_cast %123 : vector<1xf32> to vector<1x1xf32>
    %cst_43 = arith.constant 8.000000e+00 : f32
    %125 = vector.broadcast %cst_43 : f32 to vector<1x1xf32>
    %126 = arith.divf %124, %125 : vector<1x1xf32>
    %127 = vector.extract_strided_slice %91 {offsets = [8, 0], sizes = [8, 16], strides = [1, 1]} : vector<16x16xf32> to vector<8x16xf32>
    %cst_44 = arith.constant 2.000000e-02 : f32
    %128 = vector.broadcast %cst_44 : f32 to vector<8x16xf32>
    %129 = arith.cmpf ogt, %127, %128 : vector<8x16xf32>
    %cst_45 = arith.constant 2.000000e-02 : f32
    %130 = vector.broadcast %cst_45 : f32 to vector<8x16xf32>
    %131 = arith.subf %127, %130 : vector<8x16xf32>
    %cst_46 = arith.constant 0.000000e+00 : f32
    %132 = vector.broadcast %cst_46 : f32 to vector<8x16xf32>
    %133 = arith.select %129, %131, %132 : vector<8x16xi1>, vector<8x16xf32>
    %134 = arith.mulf %133, %133 : vector<8x16xf32>
    %cst_47 = arith.constant dense<0.000000e+00> : vector<8xf32>
    %135 = vector.multi_reduction <add>, %134, %cst_47 [1] : vector<8x16xf32> to vector<8xf32>
    %136 = vector.shape_cast %135 : vector<8xf32> to vector<8x1xf32>
    %cst_48 = arith.constant dense<0.000000e+00> : vector<1xf32>
    %137 = vector.multi_reduction <add>, %136, %cst_48 [0] : vector<8x1xf32> to vector<1xf32>
    %138 = vector.shape_cast %137 : vector<1xf32> to vector<1x1xf32>
    %cst_49 = arith.constant 1.280000e+02 : f32
    %139 = vector.broadcast %cst_49 : f32 to vector<1x1xf32>
    %140 = arith.divf %138, %139 : vector<1x1xf32>
    %cst_50 = arith.constant 5.000000e-02 : f32
    %141 = vector.broadcast %cst_50 : f32 to vector<8x16xf32>
    %142 = arith.cmpf olt, %42, %141 : vector<8x16xf32>
    %cst_51 = arith.constant 5.000000e-02 : f32
    %143 = vector.broadcast %cst_51 : f32 to vector<8x16xf32>
    %144 = arith.subf %42, %143 : vector<8x16xf32>
    %cst_52 = arith.constant 0.000000e+00 : f32
    %145 = vector.broadcast %cst_52 : f32 to vector<8x16xf32>
    %146 = arith.select %142, %144, %145 : vector<8x16xi1>, vector<8x16xf32>
    %147 = arith.mulf %146, %146 : vector<8x16xf32>
    %cst_53 = arith.constant dense<0.000000e+00> : vector<8xf32>
    %148 = vector.multi_reduction <add>, %147, %cst_53 [1] : vector<8x16xf32> to vector<8xf32>
    %149 = vector.shape_cast %148 : vector<8xf32> to vector<8x1xf32>
    %cst_54 = arith.constant dense<0.000000e+00> : vector<1xf32>
    %150 = vector.multi_reduction <add>, %149, %cst_54 [0] : vector<8x1xf32> to vector<1xf32>
    %151 = vector.shape_cast %150 : vector<1xf32> to vector<1x1xf32>
    %cst_55 = arith.constant 1.280000e+02 : f32
    %152 = vector.broadcast %cst_55 : f32 to vector<1x1xf32>
    %153 = arith.divf %151, %152 : vector<1x1xf32>
    %cst_56 = arith.constant 5.000000e-02 : f32
    %154 = vector.broadcast %cst_56 : f32 to vector<8x16xf32>
    %155 = arith.cmpf olt, %26, %154 : vector<8x16xf32>
    %cst_57 = arith.constant 5.000000e-02 : f32
    %156 = vector.broadcast %cst_57 : f32 to vector<8x16xf32>
    %157 = arith.subf %26, %156 : vector<8x16xf32>
    %cst_58 = arith.constant 0.000000e+00 : f32
    %158 = vector.broadcast %cst_58 : f32 to vector<8x16xf32>
    %159 = arith.select %155, %157, %158 : vector<8x16xi1>, vector<8x16xf32>
    %160 = arith.mulf %159, %159 : vector<8x16xf32>
    %cst_59 = arith.constant dense<0.000000e+00> : vector<8xf32>
    %161 = vector.multi_reduction <add>, %160, %cst_59 [1] : vector<8x16xf32> to vector<8xf32>
    %162 = vector.shape_cast %161 : vector<8xf32> to vector<8x1xf32>
    %cst_60 = arith.constant dense<0.000000e+00> : vector<1xf32>
    %163 = vector.multi_reduction <add>, %162, %cst_60 [0] : vector<8x1xf32> to vector<1xf32>
    %164 = vector.shape_cast %163 : vector<1xf32> to vector<1x1xf32>
    %cst_61 = arith.constant 1.280000e+02 : f32
    %165 = vector.broadcast %cst_61 : f32 to vector<1x1xf32>
    %166 = arith.divf %164, %165 : vector<1x1xf32>
    %167 = arith.addf %153, %166 : vector<1x1xf32>
    %cst_62 = arith.constant 5.000000e-02 : f32
    %168 = vector.broadcast %cst_62 : f32 to vector<8x16xf32>
    %169 = arith.cmpf olt, %48, %168 : vector<8x16xf32>
    %cst_63 = arith.constant 5.000000e-02 : f32
    %170 = vector.broadcast %cst_63 : f32 to vector<8x16xf32>
    %171 = arith.subf %48, %170 : vector<8x16xf32>
    %cst_64 = arith.constant 0.000000e+00 : f32
    %172 = vector.broadcast %cst_64 : f32 to vector<8x16xf32>
    %173 = arith.select %169, %171, %172 : vector<8x16xi1>, vector<8x16xf32>
    %174 = arith.mulf %173, %173 : vector<8x16xf32>
    %cst_65 = arith.constant dense<0.000000e+00> : vector<8xf32>
    %175 = vector.multi_reduction <add>, %174, %cst_65 [1] : vector<8x16xf32> to vector<8xf32>
    %176 = vector.shape_cast %175 : vector<8xf32> to vector<8x1xf32>
    %cst_66 = arith.constant dense<0.000000e+00> : vector<1xf32>
    %177 = vector.multi_reduction <add>, %176, %cst_66 [0] : vector<8x1xf32> to vector<1xf32>
    %178 = vector.shape_cast %177 : vector<1xf32> to vector<1x1xf32>
    %cst_67 = arith.constant 1.280000e+02 : f32
    %179 = vector.broadcast %cst_67 : f32 to vector<1x1xf32>
    %180 = arith.divf %178, %179 : vector<1x1xf32>
    %181 = arith.addf %167, %180 : vector<1x1xf32>
    %cst_68 = arith.constant 1.000000e+00 : f32
    %182 = vector.broadcast %cst_68 : f32 to vector<1x1xf32>
    %183 = arith.mulf %182, %81 : vector<1x1xf32>
    %cst_69 = arith.constant 1.000000e+00 : f32
    %184 = vector.broadcast %cst_69 : f32 to vector<1x1xf32>
    %185 = arith.mulf %184, %140 : vector<1x1xf32>
    %cst_70 = arith.constant 1.000000e-01 : f32
    %186 = vector.broadcast %cst_70 : f32 to vector<1x1xf32>
    %187 = arith.mulf %186, %181 : vector<1x1xf32>
    %cst_71 = arith.constant 5.000000e-01 : f32
    %188 = vector.broadcast %cst_71 : f32 to vector<1x1xf32>
    %189 = arith.mulf %188, %119 : vector<1x1xf32>
    %cst_72 = arith.constant 5.000000e-01 : f32
    %190 = vector.broadcast %cst_72 : f32 to vector<1x1xf32>
    %191 = arith.mulf %190, %126 : vector<1x1xf32>
    %192 = arith.addf %183, %185 : vector<1x1xf32>
    %193 = arith.addf %192, %187 : vector<1x1xf32>
    %194 = arith.addf %193, %189 : vector<1x1xf32>
    %195 = arith.addf %194, %191 : vector<1x1xf32>
    %cst_73 = arith.constant 0.000000e+00 : f32
    %196 = vector.broadcast %cst_73 : f32 to vector<1x8xf32>
    %c0_74 = arith.constant 0 : index
    %c0_75 = arith.constant 0 : index
    %197 = vector.load %arg6[%c0_74, %c0_75] : memref<1x8xf32, #tpu.memory_space<vmem>>, vector<1x8xf32>
    tpu.vector_store %arg6[%c0_74, %c0_75], %196 {strides = array<i32>} : memref<1x8xf32, #tpu.memory_space<vmem>>, vector<1x8xf32>,
    %c0_76 = arith.constant 0 : index
    %c0_77 = arith.constant 0 : index
    %198 = vector.load %arg6[%c0_76, %c0_77] : memref<1x8xf32, #tpu.memory_space<vmem>>, vector<1x1xf32>
    tpu.vector_store %arg6[%c0_76, %c0_77], %195 {strides = array<i32>} : memref<1x8xf32, #tpu.memory_space<vmem>>, vector<1x1xf32>,
    %c0_78 = arith.constant 0 : index
    %c1_79 = arith.constant 1 : index
    %199 = vector.load %arg6[%c0_78, %c1_79] : memref<1x8xf32, #tpu.memory_space<vmem>>, vector<1x1xf32>
    tpu.vector_store %arg6[%c0_78, %c1_79], %183 {strides = array<i32>} : memref<1x8xf32, #tpu.memory_space<vmem>>, vector<1x1xf32>,
    %c0_80 = arith.constant 0 : index
    %c2 = arith.constant 2 : index
    %200 = vector.load %arg6[%c0_80, %c2] : memref<1x8xf32, #tpu.memory_space<vmem>>, vector<1x1xf32>
    tpu.vector_store %arg6[%c0_80, %c2], %185 {strides = array<i32>} : memref<1x8xf32, #tpu.memory_space<vmem>>, vector<1x1xf32>,
    %c0_81 = arith.constant 0 : index
    %c3 = arith.constant 3 : index
    %201 = vector.load %arg6[%c0_81, %c3] : memref<1x8xf32, #tpu.memory_space<vmem>>, vector<1x1xf32>
    tpu.vector_store %arg6[%c0_81, %c3], %187 {strides = array<i32>} : memref<1x8xf32, #tpu.memory_space<vmem>>, vector<1x1xf32>,
    %c0_82 = arith.constant 0 : index
    %c4 = arith.constant 4 : index
    %202 = vector.load %arg6[%c0_82, %c4] : memref<1x8xf32, #tpu.memory_space<vmem>>, vector<1x1xf32>
    tpu.vector_store %arg6[%c0_82, %c4], %189 {strides = array<i32>} : memref<1x8xf32, #tpu.memory_space<vmem>>, vector<1x1xf32>,
    %c0_83 = arith.constant 0 : index
    %c5 = arith.constant 5 : index
    %203 = vector.load %arg6[%c0_83, %c5] : memref<1x8xf32, #tpu.memory_space<vmem>>, vector<1x1xf32>
    tpu.vector_store %arg6[%c0_83, %c5], %191 {strides = array<i32>} : memref<1x8xf32, #tpu.memory_space<vmem>>, vector<1x1xf32>,
    return
  }
}

</mosaic_0001>

<bundles_post_ra>
// kernel: box_embed_forward.1
= control target key start
LH: loop header
LB: loop body
LE: loop exit
PB: predicated region body
PF: predicated region fallthrough
CT: control target
= control target key end

     0   :  { %v2262_v57 = vmov 0.0   ;;  %vm1673_vm0 = vmmov 0   ;;  %vm596_vm1 = vcmask 523264   ;;  %s1674_s21 = smov 112   ;;  %s1676_s22 = smov 124   ;;  %vm1054_vm9 = vcmask 130048   ;;  %s2255_s3 = inlined_call_operand.vmem [shape: bf16[768,64], index: 3, kind: input, shape index: {}]   ;;  %s2256_s0 = inlined_call_operand.vmem [shape: bf16[8,768], index: 0, kind: input, shape index: {}]   ;;  %s2257_s4 = inlined_call_operand.vmem [shape: bf16[64,32], index: 4, kind: input, shape index: {}]   ;;  %s2258_s1 = inlined_call_operand.vmem [shape: bf16[8,768], index: 1, kind: input, shape index: {}]   ;;  %s2259_s5 = inlined_call_operand.vmem [shape: f32[2,64], index: 5, kind: input, shape index: {}]   ;;  %s2260_s2 = inlined_call_operand.vmem [shape: bf16[8,768], index: 2, kind: input, shape index: {}]   ;;  %s2261_s6 = inlined_call_operand.vmem [shape: f32[1,8], index: 6, kind: output, shape index: {}]  }
   0x1   :  { %v1719_v0 = vld [vmem:[%s2255_s3 + $0x40] sm:$0xff]   ;;  %v1742_v4 = vld [vmem:[%s2255_s3 + $0x48] sm:$0xff]   ;;  %v1766_v8 = vld [vmem:[%s2255_s3 + $0x50] sm:$0xff]   ;;  %s1677_s23 = smov 126   ;;  %s1678_s24 = smov 127   ;;  %vm1134_vm11 = vcmask 7168  }
   0x2   :  { %v1724_v1 = vld [vmem:[%s2255_s3] sm:$0xff]   ;;  %1336 = vmatprep.subr.bf16.mxu0 %v1719_v0  ;;  %v1748_v5 = vld [vmem:[%s2255_s3 + $0x8] sm:$0xff]   ;;  %v1772_v9 = vld [vmem:[%s2255_s3 + $0x10] sm:$0xff]   ;;  %s1679_s25 = smov 4   ;;  %vm1228_vm12 = vcmask 57344   ;;  %s1680_s27 = smov 5  }
   0x3   :  { %v1730_v2 = vld [vmem:[%s2255_s3 + $0xc0] sm:$0xff]   ;;  %1337 = vmatpush3.bf16.msra.mxu0 %v1724_v1  ;;  %v1754_v6 = vld [vmem:[%s2255_s3 + $0xc8] sm:$0xff]   ;;  %v1778_v10 = vld [vmem:[%s2255_s3 + $0xd0] sm:$0xff]   ;;  %vm1230_vm13 = vcmask 0   ;;  %vm1232_vm14 = vcmask 8200   ;;  %vm1234_vm15 = vcmask 16400  }
   0x4   :  { %v1736_v3 = vld [vmem:[%s2255_s3 + $0x80] sm:$0xff]   ;;  %1358 = vmatprep.subr.bf16.mxu1 %v1730_v2  ;;  %1338 = vmatprep.subr.bf16.mxu0 %v1742_v4  ;;  %v1760_v7 = vld [vmem:[%s2255_s3 + $0x88] sm:$0xff]   ;;  %v1784_v11 = vld [vmem:[%s2255_s3 + $0x90] sm:$0xff]  }
   0x5   :  { %1359 = vmatpush3.bf16.msra.mxu1 %v1736_v3  ;;  %v1790_v12 = vld [vmem:[%s2255_s3 + $0x58] sm:$0xff]   ;;  %v1814_v16 = vld [vmem:[%s2255_s3 + $0x60] sm:$0xff]   ;;  %v1838_v20 = vld [vmem:[%s2255_s3 + $0x68] sm:$0xff]  }
   0x6   :  { %1360 = vmatprep.subr.bf16.mxu1 %v1754_v6  ;;  %v1796_v13 = vld [vmem:[%s2255_s3 + $0x18] sm:$0xff]   ;;  %v1820_v17 = vld [vmem:[%s2255_s3 + $0x20] sm:$0xff]   ;;  %v1844_v21 = vld [vmem:[%s2255_s3 + $0x28] sm:$0xff]  }
   0x7   :  { %1339 = vmatpush3.bf16.msra.mxu0 %v1748_v5  ;;  %v1802_v14 = vld [vmem:[%s2255_s3 + $0xd8] sm:$0xff]   ;;  %v1826_v18 = vld [vmem:[%s2255_s3 + $0xe0] sm:$0xff]   ;;  %v1850_v22 = vld [vmem:[%s2255_s3 + $0xe8] sm:$0xff]  }
   0x8   :  { %1340 = vmatprep.subr.bf16.mxu0 %v1766_v8  ;;  %v1808_v15 = vld [vmem:[%s2255_s3 + $0x98] sm:$0xff]   ;;  %v1832_v19 = vld [vmem:[%s2255_s3 + $0xa0] sm:$0xff]   ;;  %v1856_v23 = vld [vmem:[%s2255_s3 + $0xa8] sm:$0xff]  }
   0x9   :  { %1361 = vmatpush3.bf16.msra.mxu1 %v1760_v7  ;;  %v1862_v24 = vld [vmem:[%s2255_s3 + $0x70] sm:$0xff]   ;;  %v1886_v28 = vld [vmem:[%s2255_s3 + $0x78] sm:$0xff]   ;;  %v130_v31 = vld [vmem:[%s2256_s0] sm:$0xff] }
   0xa   :  { %1362 = vmatprep.subr.bf16.mxu1 %v1778_v10  ;;  %v1868_v25 = vld [vmem:[%s2255_s3 + $0x30] sm:$0xff]   ;;  %v1892_v29 = vld [vmem:[%s2255_s3 + $0x38] sm:$0xff]   ;;  %v1255_v32 = vcombine.low %v130_v31, %v130_v31  ;;  %v1256_v33 = vcombine.high %v130_v31, %v130_v31  ;;  %v1913_v35 = vld [vmem:[%s2255_s3 + $0x140] sm:$0xff]  }
   0xb   :  { %1341 = vmatpush3.bf16.msra.mxu0 %v1772_v9  ;;  %v1874_v26 = vld [vmem:[%s2255_s3 + $0xf0] sm:$0xff]   ;;  %v1898_v30 = vld [vmem:[%s2255_s3 + $0xf8] sm:$0xff]   ;;  %v131_v36 = vld [vmem:[%s2256_s0 + $0x8] sm:$0xff] }
   0xc   :  { %1342 = vmatprep.subr.bf16.mxu0 %v1790_v12  ;;  %v1880_v27 = vld [vmem:[%s2255_s3 + $0xb0] sm:$0xff]   ;;  %2270 = vst [vmem:[#allocation2_spill] sm:$0xff] %v1898_v30  ;;  %v1908_v34 = vld [vmem:[%s2255_s3 + $0xb8] sm:$0xff]   ;;  %478 = vmatprep.mubr.bf16.mxu0 %v1256_v33  ;;  %v1257_v37 = vcombine.low %v131_v36, %v131_v36  ;;  %v1258_v38 = vcombine.high %v131_v36, %v131_v36  ;;  %v1922_v39 = vld [vmem:[%s2255_s3 + $0x100] sm:$0xff]  }
   0xd   :  { %1363 = vmatpush3.bf16.msra.mxu1 %v1784_v11  ;;  %2271 = vst [vmem:[#allocation3_spill] sm:$0xff] %v1908_v34  ;;  %v1928_v40 = vld [vmem:[%s2255_s3 + $0x148] sm:$0xff]   ;;  %v1940_v42 = vld [vmem:[%s2255_s3 + $0x150] sm:$0xff]   ;;  %v1952_v44 = vld [vmem:[%s2255_s3 + $0x158] sm:$0xff]  }
   0xe   :  { %1364 = vmatprep.subr.bf16.mxu1 %v1802_v14  ;;  %518 = vmatprep.mubr.bf16.mxu1 %v1258_v38  ;;  %v1934_v41 = vld [vmem:[%s2255_s3 + $0x108] sm:$0xff]   ;;  %v1946_v43 = vld [vmem:[%s2255_s3 + $0x110] sm:$0xff]   ;;  %v1958_v45 = vld [vmem:[%s2255_s3 + $0x118] sm:$0xff]  }
   0xf   :  { %1343 = vmatpush3.bf16.msra.mxu0 %v1796_v13  ;;  %v1964_v46 = vld [vmem:[%s2255_s3 + $0x160] sm:$0xff]   ;;  %v132_v48 = vld [vmem:[%s2256_s0 + $0x10] sm:$0xff]  ;;  %v1979_v49 = vld [vmem:[%s2255_s3 + $0x168] sm:$0xff]  }
  0x10   :  { %1344 = vmatprep.subr.bf16.mxu0 %v1814_v16  ;;  %v1970_v47 = vld [vmem:[%s2255_s3 + $0x120] sm:$0xff]   ;;  %v1260_v50 = vcombine.high %v132_v48, %v132_v48  ;;  %v1985_v51 = vld [vmem:[%s2255_s3 + $0x128] sm:$0xff]   ;;  %v1991_v52 = vld [vmem:[%s2255_s3 + $0x170] sm:$0xff]   ;;  %v1259_v56 = vcombine.low %v132_v48, %v132_v48 }
  0x11   :  { %1365 = vmatpush3.bf16.msra.mxu1 %v1808_v15  ;;  %v1997_v53 = vld [vmem:[%s2255_s3 + $0x130] sm:$0xff]   ;;  %v2003_v54 = vld [vmem:[%s2255_s3 + $0x178] sm:$0xff]   ;;  %v2033_v58 = vld [vmem:[%s2257_s4] sm:$0xff]  }
  0x12   :  { %1366 = vmatprep.subr.bf16.mxu1 %v1826_v18  ;;  %v2009_v55 = vld [vmem:[%s2255_s3 + $0x138] sm:$0xff]   ;;  %2272 = vst [vmem:[#allocation4_spill] sm:$0xff] %v2033_v58  ;;  %v2039_v59 = vld [vmem:[%s2257_s4 + $0x8] sm:$0xff]   ;;  %v2048_v60 = vld [vmem:[%s2257_s4 + $0x10] sm:$0xff]  }
  0x13   :  { %1345 = vmatpush3.bf16.msra.mxu0 %v1820_v17  ;;  %2273 = vst [vmem:[#allocation5_spill] sm:$0xff] %v2039_v59  ;;  %2274 = vst [vmem:[#allocation6_spill] sm:$0xff] %v2048_v60  ;;  %v2055_v61 = vld [vmem:[%s2257_s4 + $0x18] sm:$0xff]   ;;  %v641_v62 = vld [vmem:[%s2258_s1 + $0x8] sm:$0xff] }
  0x14   :  { %1346 = vmatprep.subr.bf16.mxu0 %v1838_v20  ;;  %2275 = vst [vmem:[#allocation7_spill] sm:$0xff] %v2055_v61  ;;  %v1318_v63 = vcombine.high %v641_v62, %v641_v62  ;;  %v1317_v31 = vcombine.low %v641_v62, %v641_v62  ;;  %v2077_v33 = vld [vmem:[%s2259_s5] ss:$0 sm:$0xff] }
  0x15   :  { %1367 = vmatpush3.bf16.msra.mxu1 %v1832_v19 }
  0x16   :  { %1368 = vmatprep.subr.bf16.mxu1 %v1850_v22 }
  0x17   :  { %1347 = vmatpush3.bf16.msra.mxu0 %v1844_v21 }
  0x18   :  { %1348 = vmatprep.subr.bf16.mxu0 %v1862_v24 }
  0x19   :  { %1369 = vmatpush3.bf16.msra.mxu1 %v1856_v23 }
  0x1a   :  { %1370 = vmatprep.subr.bf16.mxu1 %v1874_v26 }
  0x1b   :  { %1349 = vmatpush3.bf16.msra.mxu0 %v1868_v25 }
  0x1c   :  { %1350 = vmatprep.subr.bf16.mxu0 %v1886_v28 }
  0x1d   :  { %1371 = vmatpush3.bf16.msra.mxu1 %v1880_v27 }
  0x1e   :  { %1372 = vmatprep.subr.bf16.mxu1 %v1898_v30 }
  0x1f   :  { %1351 = vmatpush3.bf16.msra.mxu0 %v1892_v29 }
  0x20   :  { %1380 = vmatprep.subr.bf16.mxu0 %v1913_v35 }
  0x21   :  { %1373 = vmatpush3.bf16.msra.mxu1 %v1908_v34 }
  0x22   :  { %479 = vmatmul.mubr.bf16.vlgmr.msra.gmra.mrb[0].mxu0 %v1255_v32  ;;  %1549 = vmatprep.subr.bf16.mxu1 %v2262_v57 }
  0x23   :  { %1381 = vmatpush3.bf16.msra.mxu0 %v1922_v39  ;;  %558 = vmatprep.mubr.bf16.mxu0 %v1260_v50 }
  0x24   :  { %519 = vmatmul.mubr.bf16.vlgmr.msra.gmra.mrb[0].mxu1 %v1257_v37  ;;  %1382 = vmatprep.subr.bf16.mxu0 %v1928_v40 }
  0x25   :  { %1550 = vmatpush3.bf16.msra.mxu1 %v2033_v58  ;;  %1557 = vmatprep.mubr.msk.bf16.mxu1 %vm1673_vm0, %v2262_v57 }
  0x26   :  { %1551 = vmatprep.subr.bf16.mxu1 %v2262_v57 }
  0x27   :  { %1383 = vmatpush3.bf16.msra.mxu0 %v1934_v41 }
  0x28   :  { %1384 = vmatprep.subr.bf16.mxu0 %v1940_v42 }
  0x29   :  { %1552 = vmatpush3.bf16.msra.mxu1 %v2039_v59 }
  0x2a   :  { %1553 = vmatprep.subr.bf16.mxu1 %v2262_v57 }
  0x2b   :  { %1385 = vmatpush3.bf16.msra.mxu0 %v1946_v43 }
  0x2c   :  { %1386 = vmatprep.subr.bf16.mxu0 %v1952_v44 }
  0x2d   :  { %1554 = vmatpush3.bf16.msra.mxu1 %v2048_v60 }
  0x2e   :  { %1555 = vmatprep.subr.bf16.mxu1 %v2262_v57 }
  0x2f   :  { %1387 = vmatpush3.bf16.msra.mxu0 %v1958_v45 }
  0x30   :  { %1388 = vmatprep.subr.bf16.mxu0 %v1964_v46 }
  0x31   :  { %1556 = vmatpush3.bf16.msra.mxu1 %v2055_v61 }
  0x32   :  { %1407 = vmatprep.subr.bf16.mxu1 %v1719_v0 }
  0x33   :  { %1389 = vmatpush3.bf16.msra.mxu0 %v1970_v47 }
  0x34   :  { %1390 = vmatprep.subr.bf16.mxu0 %v1979_v49 }
  0x37   :  { %1391 = vmatpush3.bf16.msra.mxu0 %v1985_v51 }
  0x38   :  { %1392 = vmatprep.subr.bf16.mxu0 %v1991_v52 }
  0x3b   :  { %1393 = vmatpush3.bf16.msra.mxu0 %v1997_v53 }
  0x3c   :  { %1394 = vmatprep.subr.bf16.mxu0 %v2003_v54 }
  0x3f   :  { %1395 = vmatpush3.bf16.msra.mxu0 %v2009_v55 }
  0x40   :  { %1429 = vmatprep.subr.bf16.mxu0 %v1730_v2 }
  0x42   :  { %559 = vmatmul.mubr.bf16.vlgmr.msra.gmra.mrb[4].mxu0 %v1259_v56 }
  0x43   :  { %1430 = vmatpush3.bf16.msra.mxu0 %v1736_v3  ;;  %736 = vmatprep.mubr.bf16.mxu0 %v1318_v63 }
  0x44   :  { %1431 = vmatprep.subr.bf16.mxu0 %v1754_v6 }
  0x47   :  { %1432 = vmatpush3.bf16.msra.mxu0 %v1760_v7 }
  0x48   :  { %1433 = vmatprep.subr.bf16.mxu0 %v1778_v10 }
  0x4b   :  { %1434 = vmatpush3.bf16.msra.mxu0 %v1784_v11 }
  0x4c   :  { %1435 = vmatprep.subr.bf16.mxu0 %v1802_v14 }
  0x4f   :  { %1436 = vmatpush3.bf16.msra.mxu0 %v1808_v15 }
  0x50   :  { %1437 = vmatprep.subr.bf16.mxu0 %v1826_v18 }
  0x53   :  { %1438 = vmatpush3.bf16.msra.mxu0 %v1832_v19 }
  0x54   :  { %1439 = vmatprep.subr.bf16.mxu0 %v1850_v22 }
  0x57   :  { %1440 = vmatpush3.bf16.msra.mxu0 %v1856_v23 }
  0x58   :  { %1441 = vmatprep.subr.bf16.mxu0 %v1874_v26 }
  0x5b   :  { %1442 = vmatpush3.bf16.msra.mxu0 %v1880_v27 }
  0x5c   :  { %1443 = vmatprep.subr.bf16.mxu0 %v1898_v30 }
  0x5f   :  { %1444 = vmatpush3.bf16.msra.mxu0 %v1908_v34 }
  0x60   :  { %1561 = vmatprep.subr.bf16.mxu0 %v2262_v57 }
  0x62   :  { %737 = vmatmul.mubr.bf16.vlgmr.msra.gmra.mrb[8].mxu0 %v1317_v31 }
  0x63   :  { %1562 = vmatpush3.bf16.msra.mxu0 %v2033_v58  ;;  %1569 = vmatprep.mubr.msk.bf16.mxu0 %vm1673_vm0, %v2262_v57 }
  0x64   :  { %1563 = vmatprep.subr.bf16.mxu0 %v2262_v57 }
  0x67   :  { %1564 = vmatpush3.bf16.msra.mxu0 %v2039_v59 }
  0x68   :  { %1565 = vmatprep.subr.bf16.mxu0 %v2262_v57 }
  0x6b   :  { %1566 = vmatpush3.bf16.msra.mxu0 %v2048_v60 }
  0x6c   :  { %1567 = vmatprep.subr.bf16.mxu0 %v2262_v57 }
  0x6f   :  { %1568 = vmatpush3.bf16.msra.mxu0 %v2055_v61 }
  0x70   :  { %1478 = vmatprep.subr.bf16.mxu0 %v1719_v0 }
  0xf5   :  { %v1352_v32 = vpop.f32.mrb[0].mxu0 }
  0xf6   :  { %v1353_v36 = vpop.f32.mrb[1].mxu0 }
  0xf7   :  { %v1354_v37 = vadd.f32 %v1353_v36, %v1352_v32  ;;  %v1355_v38 = vpop.f32.mrb[2].mxu0  ;;  %v1374_v48 = vpop.f32.mrb[0].mxu1  ;;  %v640_v32 = vld [vmem:[%s2258_s1] sm:$0xff] }
  0xf8   :  { %v1356_v50 = vpop.f32.mrb[3].mxu0  ;;  %v1375_v56 = vpop.f32.mrb[1].mxu1  ;;  %v1316_v38 = vcombine.high %v640_v32, %v640_v32 }
  0xf9   :  { %v481_v62 = vadd.f32 %v1354_v37, %v2077_v33  ;;  %v1376_v63 = vadd.f32 %v1375_v56, %v1374_v48  ;;  %v1377_v31 = vpop.f32.mrb[2].mxu1 }
  0xfa   :  { %v1378_v57 = vpop.f32.mrb[3].mxu1 }
  0xfb   :  { %v521_v61 = vadd.f32 %v1376_v63, %v481_v62 }
 0x115   :  { %v1396_v60 = vpop.f32.mrb[4].mxu0 }
 0x116   :  { %v1397_v0 = vpop.f32.mrb[5].mxu0 }
 0x117   :  { %v1398_v59 = vadd.f32 %v1397_v0, %v1396_v60  ;;  %v1399_v58 = vpop.f32.mrb[6].mxu0 }
 0x118   :  { %v1400_v34 = vpop.f32.mrb[7].mxu0 }
 0x119   :  { %v561_v30 = vadd.f32 %v1398_v59, %v521_v61  ;;  %v1315_v34 = vcombine.low %v640_v32, %v640_v32  ;;  %v2282_v59 = vld [vmem:[#allocation7_spill] sm:$0xff] }
 0x11b   :  { %v566_v36 = vmax.f32 %v561_v30, 0.0  ;;  %v642_v30 = vld [vmem:[%s2258_s1 + $0x10] sm:$0xff] }
 0x11c   :  { %v1320_v57 = vcombine.high %v642_v30, %v642_v30  ;;  %v1319_v58 = vcombine.low %v642_v30, %v642_v30 }
 0x11d   :  { %v567_v50 = vpack.c.bf16 %v566_v36, %v566_v36 }
 0x11f   :  { %1558 = vmatmul.mubr.msk.bf16.vlgmr.msra.gmra.mrb[4].mxu1 %vm596_vm1, %v567_v50 }
 0x120   :  { %1408 = vmatpush3.bf16.msra.mxu1 %v1724_v1  ;;  %696 = vmatprep.mubr.bf16.mxu1 %v1316_v38 }
 0x121   :  { %1409 = vmatprep.subr.bf16.mxu1 %v1742_v4 }
 0x124   :  { %1410 = vmatpush3.bf16.msra.mxu1 %v1748_v5 }
 0x125   :  { %1411 = vmatprep.subr.bf16.mxu1 %v1766_v8 }
 0x128   :  { %1412 = vmatpush3.bf16.msra.mxu1 %v1772_v9 }
 0x129   :  { %1413 = vmatprep.subr.bf16.mxu1 %v1790_v12 }
 0x12c   :  { %1414 = vmatpush3.bf16.msra.mxu1 %v1796_v13 }
 0x12d   :  { %1415 = vmatprep.subr.bf16.mxu1 %v1814_v16 }
 0x130   :  { %1416 = vmatpush3.bf16.msra.mxu1 %v1820_v17 }
 0x131   :  { %1417 = vmatprep.subr.bf16.mxu1 %v1838_v20 }
 0x134   :  { %1418 = vmatpush3.bf16.msra.mxu1 %v1844_v21 }
 0x135   :  { %1419 = vmatprep.subr.bf16.mxu1 %v1862_v24 }
 0x138   :  { %1420 = vmatpush3.bf16.msra.mxu1 %v1868_v25 }
 0x139   :  { %1421 = vmatprep.subr.bf16.mxu1 %v1886_v28 }
 0x13c   :  { %1422 = vmatpush3.bf16.msra.mxu1 %v1892_v29 }
 0x13d   :  { %1451 = vmatprep.subr.bf16.mxu1 %v1913_v35 }
 0x13f   :  { %697 = vmatmul.mubr.bf16.vlgmr.msra.gmra.mrb[8].mxu1 %v1315_v34 }
 0x140   :  { %1452 = vmatpush3.bf16.msra.mxu1 %v1922_v39  ;;  %776 = vmatprep.mubr.bf16.mxu1 %v1320_v57 }
 0x141   :  { %1453 = vmatprep.subr.bf16.mxu1 %v1928_v40 }
 0x144   :  { %1454 = vmatpush3.bf16.msra.mxu1 %v1934_v41 }
 0x145   :  { %1455 = vmatprep.subr.bf16.mxu1 %v1940_v42 }
 0x148   :  { %1456 = vmatpush3.bf16.msra.mxu1 %v1946_v43 }
 0x149   :  { %1457 = vmatprep.subr.bf16.mxu1 %v1952_v44 }
 0x14c   :  { %1458 = vmatpush3.bf16.msra.mxu1 %v1958_v45 }
 0x14d   :  { %1459 = vmatprep.subr.bf16.mxu1 %v1964_v46 }
 0x150   :  { %1460 = vmatpush3.bf16.msra.mxu1 %v1970_v47 }
 0x151   :  { %1461 = vmatprep.subr.bf16.mxu1 %v1979_v49 }
 0x154   :  { %1462 = vmatpush3.bf16.msra.mxu1 %v1985_v51 }
 0x155   :  { %1463 = vmatprep.subr.bf16.mxu1 %v1991_v52 }
 0x158   :  { %1464 = vmatpush3.bf16.msra.mxu1 %v1997_v53 }
 0x159   :  { %1465 = vmatprep.subr.bf16.mxu1 %v2003_v54 }
 0x15c   :  { %1466 = vmatpush3.bf16.msra.mxu1 %v2009_v55 }
 0x15d   :  { %1500 = vmatprep.subr.bf16.mxu1 %v1730_v2  ;;  %v2276_v2 = vld [vmem:[#allocation2_spill] sm:$0xff] }
 0x15f   :  { %777 = vmatmul.mubr.bf16.vlgmr.msra.gmra.mrb[12].mxu1 %v1319_v58 }
 0x160   :  { %1501 = vmatpush3.bf16.msra.mxu1 %v1736_v3  ;;  %v2277_v3 = vld [vmem:[#allocation3_spill] sm:$0xff] }
 0x161   :  { %1502 = vmatprep.subr.bf16.mxu1 %v1754_v6  ;;  %v2278_v6 = vmov 0.0  }
 0x162   :  { %1229 = vst.msk [vmem:[%s2261_s6] sm:$0x1] %vm1228_vm12, %v2278_v6 }
 0x164   :  { %1503 = vmatpush3.bf16.msra.mxu1 %v1760_v7  ;;  %v1445_v7 = vpop.f32.mrb[8].mxu0 }
 0x165   :  { %1504 = vmatprep.subr.bf16.mxu1 %v1778_v10  ;;  %v1446_v10 = vpop.f32.mrb[9].mxu0 }
 0x168   :  { %1505 = vmatpush3.bf16.msra.mxu1 %v1784_v11  ;;  %v1447_v11 = vadd.f32 %v1446_v10, %v1445_v7 }
 0x169   :  { %1506 = vmatprep.subr.bf16.mxu1 %v1802_v14  ;;  %v1448_v14 = vpop.f32.mrb[10].mxu0 }
 0x16c   :  { %1507 = vmatpush3.bf16.msra.mxu1 %v1808_v15  ;;  %v1449_v15 = vpop.f32.mrb[11].mxu0 }
 0x16d   :  { %1508 = vmatprep.subr.bf16.mxu1 %v1826_v18  ;;  %v830_v18 = vld [vmem:[%s2260_s2 + $0x8] sm:$0xff] }
 0x170   :  { %1509 = vmatpush3.bf16.msra.mxu1 %v1832_v19  ;;  %v1325_v19 = vcombine.high %v830_v18, %v830_v18 }
 0x171   :  { %1510 = vmatprep.subr.bf16.mxu1 %v1850_v22  ;;  %v1324_v22 = vcombine.low %v830_v18, %v830_v18 }
 0x172   :  { %925 = vmatprep.mubr.bf16.mxu1 %v1325_v19 }
 0x174   :  { %1511 = vmatpush3.bf16.msra.mxu1 %v1856_v23  ;;  %v2279_v23 = vld [vmem:[#allocation4_spill] sm:$0xff] }
 0x175   :  { %1512 = vmatprep.subr.bf16.mxu1 %v1874_v26  ;;  %v2280_v26 = vld [vmem:[#allocation5_spill] sm:$0xff] }
 0x178   :  { %1513 = vmatpush3.bf16.msra.mxu1 %v1880_v27  ;;  %v2281_v27 = vld [vmem:[#allocation6_spill] sm:$0xff] }
 0x179   :  { %1514 = vmatprep.subr.bf16.mxu1 %v2276_v2  ;;  %v829_v2 = vld [vmem:[%s2260_s2] sm:$0xff] }
 0x17a   :  { %v1323_v7 = vcombine.high %v829_v2, %v829_v2 }
 0x17c   :  { %1515 = vmatpush3.bf16.msra.mxu1 %v2277_v3 }
 0x17d   :  { %1573 = vmatprep.subr.bf16.mxu1 %v2278_v6 }
 0x17f   :  { %926 = vmatmul.mubr.bf16.vlgmr.msra.gmra.mrb[16].mxu1 %v1324_v22 }
 0x180   :  { %1574 = vmatpush3.bf16.msra.mxu1 %v2279_v23  ;;  %1581 = vmatprep.mubr.msk.bf16.mxu1 %vm1673_vm0, %v2278_v6  ;;  %vm1236_vm0 = vcmask 24600  }
 0x181   :  { %1575 = vmatprep.subr.bf16.mxu1 %v2278_v6 }
 0x184   :  { %1576 = vmatpush3.bf16.msra.mxu1 %v2280_v26 }
 0x185   :  { %1577 = vmatprep.subr.bf16.mxu1 %v2278_v6 }
 0x188   :  { %1578 = vmatpush3.bf16.msra.mxu1 %v2281_v27 }
 0x189   :  { %1579 = vmatprep.subr.bf16.mxu1 %v2278_v6 }
 0x18c   :  { %1580 = vmatpush3.bf16.msra.mxu1 %v2282_v59 }
 0x1f2   :  { %v2147_v60 = vpop.f32.mrb[4].mxu1 }
 0x1f3   :  { %v1559_v61 = vpop.f32.mrb[5].mxu1 }
 0x1f4   :  { %v637_v37 = vpop.f32.mrb[6].mxu1 }
 0x1f5   :  { %v1560_v48 = vpop.f32.mrb[7].mxu1 }
 0x212   :  { %v1423_v56 = vpop.f32.mrb[8].mxu1 }
 0x213   :  { %v1424_v62 = vpop.f32.mrb[9].mxu1 }
 0x214   :  { %v1425_v63 = vadd.f32 %v1424_v62, %v1423_v56  ;;  %v1426_v31 = vpop.f32.mrb[10].mxu1 }
 0x215   :  { %v1427_v0 = vpop.f32.mrb[11].mxu1 }
 0x216   :  { %v699_v32 = vadd.f32 %v1425_v63, %v2077_v33 }
 0x218   :  { %v739_v36 = vadd.f32 %v1447_v11, %v699_v32 }
 0x232   :  { %v1467_v38 = vpop.f32.mrb[12].mxu1 }
 0x233   :  { %v1468_v50 = vpop.f32.mrb[13].mxu1 }
 0x234   :  { %v1469_v30 = vadd.f32 %v1468_v50, %v1467_v38  ;;  %v1470_v34 = vpop.f32.mrb[14].mxu1 }
 0x235   :  { %v1471_v57 = vpop.f32.mrb[15].mxu1 }
 0x236   :  { %v779_v58 = vadd.f32 %v1469_v30, %v739_v36 }
 0x238   :  { %v784_v3 = vmax.f32 %v779_v58, 0.0 }
 0x23a   :  { %v785_v10 = vpack.c.bf16 %v784_v3, %v784_v3 }
 0x23c   :  { %1570 = vmatmul.mubr.msk.bf16.vlgmr.msra.gmra.mrb[12].mxu0 %vm596_vm1, %v785_v10 }
 0x23d   :  { %1479 = vmatpush3.bf16.msra.mxu0 %v1724_v1  ;;  %885 = vmatprep.mubr.bf16.mxu0 %v1323_v7  ;;  %v831_v1 = vld [vmem:[%s2260_s2 + $0x10] sm:$0xff] }
 0x23e   :  { %1480 = vmatprep.subr.bf16.mxu0 %v1742_v4  ;;  %v1322_v4 = vcombine.low %v829_v2, %v829_v2 }
 0x241   :  { %1481 = vmatpush3.bf16.msra.mxu0 %v1748_v5  ;;  %v1327_v5 = vcombine.high %v831_v1, %v831_v1 }
 0x242   :  { %1482 = vmatprep.subr.bf16.mxu0 %v1766_v8  ;;  %v1326_v8 = vcombine.low %v831_v1, %v831_v1 }
 0x245   :  { %1483 = vmatpush3.bf16.msra.mxu0 %v1772_v9 }
 0x246   :  { %1484 = vmatprep.subr.bf16.mxu0 %v1790_v12 }
 0x249   :  { %1485 = vmatpush3.bf16.msra.mxu0 %v1796_v13 }
 0x24a   :  { %1486 = vmatprep.subr.bf16.mxu0 %v1814_v16 }
 0x24d   :  { %1487 = vmatpush3.bf16.msra.mxu0 %v1820_v17 }
 0x24e   :  { %1488 = vmatprep.subr.bf16.mxu0 %v1838_v20  ;;  %v1309_v20 = vld [vmem:[%s2259_s5 + $0x1] ss:$0 sm:$0xff]  ;;  %s1675_s5 = smov 120  }
 0x251   :  { %1489 = vmatpush3.bf16.msra.mxu0 %v1844_v21  ;;  %v635_v21 = vadd.f32 %v1309_v20, %v2147_v60 }
 0x252   :  { %1490 = vmatprep.subr.bf16.mxu0 %v1862_v24  ;;  %v1516_v9 = vpop.f32.mrb[16].mxu1 }
 0x253   :  { %v1517_v12 = vpop.f32.mrb[17].mxu1 }
 0x254   :  { %v1518_v13 = vadd.f32 %v1517_v12, %v1516_v9  ;;  %v1519_v16 = vpop.f32.mrb[18].mxu1 }
 0x255   :  { %1491 = vmatpush3.bf16.msra.mxu0 %v1868_v25  ;;  %v1520_v17 = vpop.f32.mrb[19].mxu1 }
 0x256   :  { %1492 = vmatprep.subr.bf16.mxu0 %v1886_v28 }
 0x259   :  { %1493 = vmatpush3.bf16.msra.mxu0 %v1892_v29 }
 0x25a   :  { %1522 = vmatprep.subr.bf16.mxu0 %v1913_v35  ;;  %v1018_v35 = vmul.f32 1.442695, %v635_v21 }
 0x25c   :  { %886 = vmatmul.mubr.bf16.vlgmr.msra.gmra.mrb[16].mxu0 %v1322_v4 }
 0x25d   :  { %1523 = vmatpush3.bf16.msra.mxu0 %v1922_v39  ;;  %965 = vmatprep.mubr.bf16.mxu0 %v1327_v5 }
 0x25e   :  { %1524 = vmatprep.subr.bf16.mxu0 %v1928_v40 }
 0x261   :  { %1525 = vmatpush3.bf16.msra.mxu0 %v1934_v41 }
 0x262   :  { %1526 = vmatprep.subr.bf16.mxu0 %v1940_v42 }
 0x265   :  { %1527 = vmatpush3.bf16.msra.mxu0 %v1946_v43 }
 0x266   :  { %1528 = vmatprep.subr.bf16.mxu0 %v1952_v44 }
 0x269   :  { %1529 = vmatpush3.bf16.msra.mxu0 %v1958_v45 }
 0x26a   :  { %1530 = vmatprep.subr.bf16.mxu0 %v1964_v46 }
 0x26d   :  { %1531 = vmatpush3.bf16.msra.mxu0 %v1970_v47 }
 0x26e   :  { %1532 = vmatprep.subr.bf16.mxu0 %v1979_v49 }
 0x271   :  { %1533 = vmatpush3.bf16.msra.mxu0 %v1985_v51 }
 0x272   :  { %1534 = vmatprep.subr.bf16.mxu0 %v1991_v52 }
 0x275   :  { %1535 = vmatpush3.bf16.msra.mxu0 %v1997_v53 }
 0x276   :  { %1536 = vmatprep.subr.bf16.mxu0 %v2003_v54 }
 0x279   :  { %1537 = vmatpush3.bf16.msra.mxu0 %v2009_v55 }
 0x27c   :  { %966 = vmatmul.mubr.bf16.vlgmr.msra.gmra.mrb[20].mxu0 %v1326_v8 }
 0x30f   :  { %v823_v24 = vpop.f32.mrb[12].mxu0 }
 0x310   :  { %v2192_v25 = vadd.f32 %v1309_v20, %v823_v24  ;;  %v1571_v28 = vpop.f32.mrb[13].mxu0 }
 0x311   :  { %v826_v29 = vpop.f32.mrb[14].mxu0 }
 0x312   :  { %v1572_v39 = vpop.f32.mrb[15].mxu0  ;;  %v1021_v40 = vmul.f32 1.442695, %v2192_v25  ;;  %vm1187_vm10 = vcmp.lt.f32.partialorder %v2192_v25, 0.05 }
 0x314   :  { %1664 = vpow2.f32 %v1021_v40 }
 0x315   :  { %1666 = vpow2.f32 %v1018_v35 }
 0x31e   :  { %v1665_v41 = vpop.eup %1664 }
 0x31f   :  { %v1023_v42 = vmax.f32 %v1665_v41, 1e-38  ;;  %v1667_v43 = vpop.eup %1666 }
 0x320   :  { %v2196_v44 = vmax.f32 %v1667_v43, 1e-38 }
 0x321   :  { %1034 = vrot.lane.b32.xlu0 %v1023_v42, %s1674_s21 }
 0x322   :  { %vm1169_vm4 = vcmp.lt.f32.partialorder %v2196_v44, 0.05 }
 0x325   :  { %1028 = vrot.lane.b32.xlu0 %v2196_v44, %s1674_s21 }
 0x32f   :  { %v1494_v45 = vpop.f32.mrb[16].mxu0 }
 0x330   :  { %v1495_v46 = vpop.f32.mrb[17].mxu0 }
 0x331   :  { %v1496_v47 = vadd.f32 %v1495_v46, %v1494_v45  ;;  %v1497_v49 = vpop.f32.mrb[18].mxu0 }
 0x332   :  { %v1498_v51 = vpop.f32.mrb[19].mxu0 }
 0x333   :  { %v888_v52 = vadd.f32 %v1496_v47, %v2077_v33 }
 0x335   :  { %v928_v53 = vadd.f32 %v1518_v13, %v888_v52  ;;  %v1333_v13 = vadd.f32 -0.05, %v2196_v44 }
 0x34f   :  { %v1538_v54 = vpop.f32.mrb[20].mxu0 }
 0x350   :  { %v1539_v55 = vpop.f32.mrb[21].mxu0 }
 0x351   :  { %v1540_v11 = vadd.f32 %v1539_v55, %v1538_v54  ;;  %v1541_v14 = vpop.f32.mrb[22].mxu0 }
 0x352   :  { %v1542_v15 = vpop.f32.mrb[23].mxu0 }
 0x353   :  { %v968_v18 = vadd.f32 %v1540_v11, %v928_v53 }
 0x355   :  { %v973_v19 = vmax.f32 %v968_v18, 0.0 }
 0x357   :  { %v974_v22 = vpack.c.bf16 %v973_v19, %v973_v19 }
 0x359   :  { %1582 = vmatmul.mubr.msk.bf16.vlgmr.msra.gmra.mrb[20].mxu1 %vm596_vm1, %v974_v22  ;;  %vm1242_vm1 = vcmask 32800  }
 0x393   :  { %v1035_v23 = vpop.permute.xlu0 %1034 }
 0x394   :  { %v1037_v60 = vsub.f32 %v2192_v25, %v1035_v23  ;;  %v1038_v33 = vadd.f32 %v1035_v23, %v2192_v25 }
 0x397   :  { %v1029_v26 = vpop.permute.xlu0 %1028 }
 0x398   :  { %v2202_v27 = vsub.f32 %v635_v21, %v1029_v26  ;;  %v2204_v59 = vadd.f32 %v1029_v26, %v635_v21 }
 0x39a   :  { %v1076_v56 = vmax.f32 %v1037_v60, %v2202_v27  ;;  %v1078_v62 = vmin.f32 %v1038_v33, %v2204_v59  ;;  %v1045_v44 = vsub.f32 %v1037_v60, %v2202_v27  ;;  %v1049_v45 = vsub.f32 %v2204_v59, %v1038_v33 }
 0x39c   :  { %v1080_v32 = vsub.f32 %v1078_v62, %v1076_v56  ;;  %v1329_v46 = vadd.f32 -0.1, %v1045_v44  ;;  %vm1046_vm6 = vcmp.lt.f32.partialorder %v1045_v44, 0.1  ;;  %v1330_v49 = vadd.f32 -0.1, %v1049_v45 }
 0x39d   :  { %vm1050_vm7 = vcmp.lt.f32.partialorder %v1049_v45, 0.1 }
 0x39e   :  { %v1082_v36 = vmul.f32 0.5, %v1080_v32  ;;  %v1048_v47 = vsel %vm1046_vm6, %v1329_v46, 0.0  ;;  %v1052_v52 = vsel %vm1050_vm7, %v1330_v49, 0.0 }
 0x39f   :  { %v1053_v51 = vmul.f32 %v1048_v47, %v1048_v47  ;;  %v1064_v55 = vmul.f32 %v1052_v52, %v1052_v52 }
 0x3a0   :  { %vm1084_vm2 = vcmp.gt.f32.partialorder %v1082_v36, 0.0 }
 0x3a1   :  { %v1086_v30 = vsel %vm1084_vm2, %v1082_v36, 0.0  ;;  %v1055_v54 = vsel %vm1054_vm9, %v1053_v51, 0.0  ;;  %v1065_v14 = vsel %vm1054_vm9, %v1064_v55, 0.0  ;;  %vm1248_vm2 = vcmask 41000  }
 0x42c   :  { %v1012_v61 = vpop.f32.mrb[20].mxu1 }
 0x42d   :  { %v1013_v37 = vadd.f32 %v1309_v20, %v1012_v61  ;;  %v1583_v48 = vpop.f32.mrb[21].mxu1  ;;  %v1171_v20 = vsel %vm1169_vm4, %v1333_v13, 0.0 }
 0x42e   :  { %v1015_v63 = vpop.f32.mrb[22].mxu1  ;;  %v1172_v21 = vmul.f32 %v1171_v20, %v1171_v20 }
 0x42f   :  { %v1024_v31 = vmul.f32 1.442695, %v1013_v37  ;;  %v1584_v0 = vpop.f32.mrb[23].mxu1 }
 0x431   :  { %1668 = vpow2.f32 %v1024_v31 }
 0x432   :  { %1670 = vrcp.f32 %v1035_v23 }
 0x43b   :  { %v1669_v38 = vpop.eup %1668 }
 0x43c   :  { %v1026_v50 = vmax.f32 %v1669_v38, 1e-38  ;;  %v1671_v34 = vpop.eup %1670 }
 0x43d   :  { %v1089_v57 = vmul.f32 %v1671_v34, %v1086_v30 }
 0x43e   :  { %1040 = vrot.lane.b32.xlu1 %v1026_v50, %s1674_s21  ;;  %v1335_v39 = vadd.f32 -0.05, %v1026_v50  ;;  %vm1202_vm5 = vcmp.lt.f32.partialorder %v1026_v50, 0.05 }
 0x440   :  { %v1204_v42 = vsel %vm1202_vm5, %v1335_v39, 0.0 }
 0x441   :  { %v1205_v43 = vmul.f32 %v1204_v42, %v1204_v42 }
 0x442   :  { %1093 = vrot.lane.b32.xlu1 %v1089_v57, %s1675_s5 }
 0x4b0   :  { %v1041_v58 = vpop.permute.xlu1 %1040 }
 0x4b1   :  { %v1043_v2 = vsub.f32 %v1013_v37, %v1041_v58  ;;  %v1044_v3 = vadd.f32 %v1041_v58, %v1013_v37 }
 0x4b3   :  { %v1077_v7 = vmax.f32 %v1037_v60, %v1043_v2  ;;  %v1079_v10 = vmin.f32 %v1038_v33, %v1044_v3  ;;  %v1334_v60 = vadd.f32 -0.05, %v2192_v25 }
 0x4b4   :  { %v1094_v1 = vpop.permute.xlu1 %1093 }
 0x4b5   :  { %v1081_v4 = vsub.f32 %v1079_v10, %v1077_v7  ;;  %v1099_v5 = vmul.f32 %v1094_v1, %v1089_v57  ;;  %v1189_v61 = vsel %vm1187_vm10, %v1334_v60, 0.0 }
 0x4b6   :  { %v1190_v56 = vmul.f32 %v1189_v61, %v1189_v61 }
 0x4b7   :  { %v1083_v8 = vmul.f32 0.5, %v1081_v4  ;;  %1103 = vrot.lane.b32.xlu1 %v1099_v5, %s1676_s22 }
 0x4b8   :  { %v1191_v63 = vsel %vm1054_vm9, %v1190_v56, 0.0 }
 0x4b9   :  { %vm1085_vm3 = vcmp.gt.f32.partialorder %v1083_v8, 0.0  ;;  %v1332_v53 = vadd.f32 -0.02, %v1083_v8  ;;  %vm1154_vm8 = vcmp.gt.f32.partialorder %v1083_v8, 0.02 }
 0x4ba   :  { %v1087_v9 = vsel %vm1085_vm3, %v1083_v8, 0.0 }
 0x4bb   :  { %v1090_v12 = vmul.f32 %v1671_v34, %v1087_v9  ;;  %v1156_v11 = vsel %vm1154_vm8, %v1332_v53, 0.0 }
 0x4bc   :  { %v1157_v15 = vmul.f32 %v1156_v11, %v1156_v11 }
 0x4bd   :  { %1095 = vrot.lane.b32.xlu0 %v1090_v12, %s1675_s5 }
 0x4be   :  { %v1158_v18 = vsel %vm1054_vm9, %v1157_v15, 0.0 }
 0x529   :  { %v1104_v16 = vpop.permute.xlu1 %1103 }
 0x52a   :  { %v1109_v17 = vmul.f32 %v1104_v16, %v1099_v5 }
 0x52c   :  { %1113 = vrot.lane.b32.xlu1 %v1109_v17, %s1677_s23 }
 0x52f   :  { %v1096_v24 = vpop.permute.xlu0 %1095 }
 0x530   :  { %v1100_v28 = vmul.f32 %v1096_v24, %v1090_v12  ;;  %1174 = vrot.lane.b32.xlu1 %v1172_v21, %s1674_s21 }
 0x532   :  { %1105 = vrot.lane.b32.xlu0 %v1100_v28, %s1676_s22 }
 0x59e   :  { %v1114_v29 = vpop.permute.xlu1 %1113 }
 0x59f   :  { %v1119_v35 = vmul.f32 %v1114_v29, %v1109_v17 }
 0x5a1   :  { %1123 = vrot.lane.b32.xlu1 %v1119_v35, %s1678_s24 }
 0x5a2   :  { %v1175_v23 = vpop.permute.xlu1 %1174 }
 0x5a3   :  { %v1177_v48 = vsel %vm1054_vm9, %v1175_v23, 0.0 }
 0x5a4   :  { %v1106_v40 = vpop.permute.xlu0 %1105 }
 0x5a5   :  { %v1110_v41 = vmul.f32 %v1106_v40, %v1100_v28 }
 0x5a7   :  { %1115 = vrot.lane.b32.xlu0 %v1110_v41, %s1677_s23 }
 0x5ab   :  { %1207 = vrot.lane.b32.xlu0 %v1205_v43, %s1674_s21 }
 0x5c5   :  { %1056 = vadd.xlane.f32.xlu1 %v1055_v54 }
 0x5c9   :  { %1066 = vadd.xlane.f32.xlu1 %v1065_v14 }
 0x5cd   :  { %1159 = vadd.xlane.f32.xlu1 %v1158_v18 }
 0x613   :  { %v1124_v26 = vpop.permute.xlu1 %1123 }
 0x614   :  { %v1129_v27 = vmul.f32 %v1124_v26, %v1119_v35 }
 0x616   :  { %v1331_v59 = vadd.f32 -1.0, %v1129_v27 }
 0x618   :  { %v1132_v33 = vmul.f32 %v1331_v59, %v1331_v59 }
 0x619   :  { %v1116_v19 = vpop.permute.xlu0 %1115 }
 0x61a   :  { %v1120_v22 = vmul.f32 %v1116_v19, %v1110_v41  ;;  %v1135_v37 = vsel %vm1134_vm11, %v1132_v33, 0.0 }
 0x61b   :  { %v1136_v62 = vrot.slane %v1135_v37, 4 }
 0x61c   :  { %1125 = vrot.lane.b32.xlu0 %v1120_v22, %s1678_s24 }
 0x61d   :  { %v1137_v31 = vadd.f32 %v1136_v62, %v1135_v37  ;;  %v1208_v0 = vpop.permute.xlu0 %1207 }
 0x61e   :  { %v1210_v32 = vsel %vm1054_vm9, %v1208_v0, 0.0 }
 0x61f   :  { %v1138_v36 = vrot.slane %v1137_v31, 2 }
 0x621   :  { %v1139_v38 = vadd.f32 %v1138_v36, %v1137_v31 }
 0x623   :  { %v1140_v25 = vrot.slane %v1139_v38, 1 }
 0x625   :  { %v1141_v50 = vadd.f32 %v1140_v25, %v1139_v38 }
 0x627   :  { %v1143_v30 = vmul.f32 0.125, %v1141_v50 }
 0x629   :  { %v2228_v34 = vmul.f32 0.5, %v1143_v30 }
 0x63b   :  { %1178 = vadd.xlane.f32.xlu0 %v1177_v48 }
 0x63f   :  { %1192 = vadd.xlane.f32.xlu0 %v1191_v63 }
 0x643   :  { %1211 = vadd.xlane.f32.xlu0 %v1210_v32 }
 0x652   :  { %v1057_v13 = vpop.xlane.xlu1 %1056 }
 0x653   :  { %v1058_v6 = vrot.slane %v1057_v13, 4 }
 0x655   :  { %v1059_v29 = vadd.f32 %v1058_v6, %v1057_v13 }
 0x656   :  { %v1067_v16 = vpop.xlane.xlu1 %1066 }
 0x657   :  { %v1068_v20 = vrot.slane %v1067_v16, 4  ;;  %v1060_v43 = vrot.slane %v1059_v29, 2 }
 0x659   :  { %1239 = vrot.lane.b32.xlu0 %v2228_v34, %s1679_s25  ;;  %v1069_v24 = vadd.f32 %v1068_v20, %v1067_v16  ;;  %v1061_v53 = vadd.f32 %v1060_v43, %v1059_v29 }
 0x65a   :  { %v1160_v17 = vpop.xlane.xlu1 %1159 }
 0x65b   :  { %v1161_v21 = vrot.slane %v1160_v17, 4  ;;  %v1070_v40 = vrot.slane %v1069_v24, 2 }
 0x65d   :  { %v1162_v35 = vadd.f32 %v1161_v21, %v1160_v17  ;;  %v1071_v47 = vadd.f32 %v1070_v40, %v1069_v24 }
 0x65f   :  { %v1163_v44 = vrot.slane %v1162_v35, 2  ;;  %v1072_v14 = vrot.slane %v1071_v47, 1 }
 0x661   :  { %v1164_v54 = vadd.f32 %v1163_v44, %v1162_v35  ;;  %v1073_v59 = vadd.f32 %v1072_v14, %v1071_v47 }
 0x663   :  { %v1165_v23 = vrot.slane %v1164_v54, 1 }
 0x665   :  { %v1166_v48 = vadd.f32 %v1165_v23, %v1164_v54 }
 0x667   :  { %v1168_v32 = vmul.f32 0.0078125, %v1166_v48 }
 0x68e   :  { %v1126_v57 = vpop.permute.xlu0 %1125 }
 0x68f   :  { %v1130_v58 = vmul.f32 %v1126_v57, %v1120_v22  ;;  %v1062_v22 = vrot.slane %v1061_v53, 1 }
 0x691   :  { %v1144_v2 = vmul.f32 %v1130_v58, %v1130_v58  ;;  %v1063_v37 = vadd.f32 %v1062_v22, %v1061_v53 }
 0x693   :  { %v1146_v3 = vsel %vm1134_vm11, %v1144_v2, 0.0  ;;  %v1074_v63 = vadd.f32 %v1073_v59, %v1063_v37 }
 0x694   :  { %v1147_v7 = vrot.slane %v1146_v3, 4 }
 0x695   :  { %v1075_v25 = vmul.f32 0.00390625, %v1074_v63 }
 0x696   :  { %v1148_v10 = vadd.f32 %v1147_v7, %v1146_v3 }
 0x697   :  { %v1224_v30 = vadd.f32 %v1168_v32, %v1075_v25 }
 0x698   :  { %v1149_v1 = vrot.slane %v1148_v10, 2 }
 0x69a   :  { %v1150_v4 = vadd.f32 %v1149_v1, %v1148_v10 }
 0x69c   :  { %v1151_v5 = vrot.slane %v1150_v4, 1 }
 0x69e   :  { %v1152_v8 = vadd.f32 %v1151_v5, %v1150_v4 }
 0x6a0   :  { %v1153_v9 = vmul.f32 0.125, %v1152_v8 }
 0x6a2   :  { %v1223_v12 = vmul.f32 0.5, %v1153_v9 }
 0x6a4   :  { %1245 = vrot.lane.b32.xlu1 %v1223_v12, %s1680_s27 }
 0x6c8   :  { %v1179_v28 = vpop.xlane.xlu0 %1178 }
 0x6c9   :  { %v1180_v39 = vrot.slane %v1179_v28, 4 }
 0x6cb   :  { %v1181_v41 = vadd.f32 %v1180_v39, %v1179_v28 }
 0x6cc   :  { %v1193_v42 = vpop.xlane.xlu0 %1192 }
 0x6cd   :  { %v1182_v45 = vrot.slane %v1181_v41, 2  ;;  %v1194_v46 = vrot.slane %v1193_v42, 4 }
 0x6cf   :  { %v1183_v49 = vadd.f32 %v1182_v45, %v1181_v41  ;;  %v1195_v51 = vadd.f32 %v1194_v46, %v1193_v42 }
 0x6d0   :  { %v1212_v52 = vpop.xlane.xlu0 %1211 }
 0x6d1   :  { %v1196_v55 = vrot.slane %v1195_v51, 2  ;;  %v1213_v11 = vrot.slane %v1212_v52, 4  ;;  %v1184_v15 = vrot.slane %v1183_v49, 1 }
 0x6d3   :  { %v1197_v18 = vadd.f32 %v1196_v55, %v1195_v51  ;;  %v1214_v19 = vadd.f32 %v1213_v11, %v1212_v52  ;;  %v1185_v60 = vadd.f32 %v1184_v15, %v1183_v49 }
 0x6d5   :  { %v1198_v26 = vrot.slane %v1197_v18, 1  ;;  %v1215_v27 = vrot.slane %v1214_v19, 2  ;;  %v1186_v31 = vmul.f32 0.0078125, %v1185_v60 }
 0x6d7   :  { %v1199_v33 = vadd.f32 %v1198_v26, %v1197_v18  ;;  %v1216_v61 = vadd.f32 %v1215_v27, %v1214_v19 }
 0x6d9   :  { %v1200_v56 = vmul.f32 0.0078125, %v1199_v33  ;;  %v1217_v62 = vrot.slane %v1216_v61, 1 }
 0x6db   :  { %v1218_v0 = vadd.f32 %v1217_v62, %v1216_v61  ;;  %v1201_v36 = vadd.f32 %v1200_v56, %v1186_v31 }
 0x6dd   :  { %v1219_v38 = vmul.f32 0.0078125, %v1218_v0 }
 0x6df   :  { %v1220_v50 = vadd.f32 %v1219_v38, %v1201_v36 }
 0x6e1   :  { %v1221_v57 = vmul.f32 0.1, %v1220_v50 }
 0x6e3   :  { %v1225_v58 = vadd.f32 %v1224_v30, %v1221_v57 }
 0x6e5   :  { %v1226_v2 = vadd.f32 %v1225_v58, %v2228_v34  ;;  %v1240_v34 = vpop.permute.xlu0 %1239 }
 0x6e7   :  { %v1227_v3 = vadd.f32 %v1226_v2, %v1223_v12 }
 0x6e9   :  { %1231 = vst.msk [vmem:[%s2261_s6] sm:$0x1] %vm1230_vm13, %v1227_v3 }
 0x6ea   :  { %1233 = vst.msk [vmem:[%s2261_s6] sm:$0x1] %vm1232_vm14, %v1075_v25 }
 0x6eb   :  { %1235 = vst.msk [vmem:[%s2261_s6] sm:$0x1] %vm1234_vm15, %v1168_v32 }
 0x6ec   :  { %1237 = vst.msk [vmem:[%s2261_s6] sm:$0x1] %vm1236_vm0, %v1221_v57 }
 0x6ed   :  { %1243 = vst.msk [vmem:[%s2261_s6] sm:$0x1] %vm1242_vm1, %v1240_v34 }
 0x716   :  { %v1246_v7 = vpop.permute.xlu1 %1245 }
 0x717   :  { %1249 = vst.msk [vmem:[%s2261_s6] sm:$0x1] %vm1248_vm2, %v1246_v7 }

</bundles_post_ra>
